<compile_context>
chip_gen: v7x
topology: tpu7x:2x2x1
jax: 0.10.0
libtpu: 0.0.40
codegen_flags: <defaults>
</compile_context>

<pallas_src>
import functools

import jax
import jax.numpy as jnp
from jax.experimental import pallas as pl
from jax.experimental.pallas import tpu as pltpu

_HIDDEN = 256          # fixed by the module: Linear(n_in, 256)
_LEAKY_SLOPE = 0.01    # torch.nn.LeakyReLU default negative_slope
_LANE = 128
_SUBLANE = 8
_MIB = 1024 * 1024


def _round_up(v, m):
    return ((v + m - 1) // m) * m


def _cdiv(a, b):
    return -(-a // b)


def _vmem_capacity_bytes():
    """Per-core VMEM capacity (v5e/v6e: 128 MiB, v7x: 64 MiB)."""
    try:
        info = pltpu.get_tpu_info()
        cap = getattr(info, "vmem_capacity_bytes", None)
        if cap:
            return int(cap)
    except Exception:
        pass
    return 64 * _MIB  # conservative (v7x-sized) fallback


def _padded_2d_bytes(rows, cols, itemsize):
    """VMEM footprint of a 2-D resident operand (sublane/lane padded)."""
    sl = max(_SUBLANE, 32 // itemsize)
    return _round_up(rows, sl) * _round_up(cols, _LANE) * itemsize


# --------------------------------------------------------------------------- #
# Kernel
# --------------------------------------------------------------------------- #
def _fused_heads_kernel(x_ref, w1_ref, b1_ref, w2_ref, b2_ref, o_ref, acc_ref,
                        *, s_total, tile_s):
    """Fused global-avg-pool + all heads' MLPs.

    x_ref : [tN, C, tS]        streamed tiles of the flattened spatial axis
    w1_ref: [C, K*256]         stacked first-layer weights (all heads)
    b1_ref: [1, K*256]
    w2_ref: [K*256, out_pad]   block-diagonal second-layer weights
    b2_ref: [1, out_pad]
    o_ref : [tN, out_pad]      lane-dense concatenated head outputs (f32)
    acc_ref: VMEM [tN, C] f32  running spatial sum
    """
    s_idx = pl.program_id(1)
    last_s = pl.num_programs(1) - 1
    rem = s_total % tile_s            # static Python int

    @pl.when(s_idx == 0)
    def _init():
        acc_ref[...] = jnp.zeros_like(acc_ref)

    def _accumulate(mask_tail):
        x = x_ref[...].astype(jnp.float32)                    # [tN, C, tS]
        if mask_tail:
            lane = jax.lax.broadcasted_iota(jnp.int32, x.shape, 2)
            x = jnp.where(lane < rem, x, 0.0)                 # zero out-of-range lanes
        acc_ref[...] += jnp.sum(x, axis=-1)                   # [tN, C]

    if rem:
        # Remainder masking kept OFF the hot path: only the final S tile pays
        # the iota + compare + select (keeps the streaming loop HBM-bound).
        @pl.when(s_idx != last_s)
        def _hot():
            _accumulate(False)

        @pl.when(s_idx == last_s)
        def _tail():
            _accumulate(True)
    else:
        _accumulate(False)

    @pl.when(s_idx == last_s)
    def _finalize():
        pooled = acc_ref[...] * (1.0 / float(s_total))        # AvgPool3d over (D,H,W)
        # Linear(n_in, 256) for every head at once (stacked columns).
        h = jnp.dot(pooled.astype(w1_ref.dtype), w1_ref[...],
                    preferred_element_type=jnp.float32)
        h = h + b1_ref[...].astype(jnp.float32)
        # Dropout -> identity in eval mode; LeakyReLU(0.01).
        h = jnp.where(h > 0, h, _LEAKY_SLOPE * h)
        # Linear(256, n_out) for every head via the block-diagonal w2.
        out = jnp.dot(h.astype(w2_ref.dtype), w2_ref[...],
                      preferred_element_type=jnp.float32)
        out = out + b2_ref[...].astype(jnp.float32)
        o_ref[...] = out.astype(o_ref.dtype)


# --------------------------------------------------------------------------- #
# Parameter packing (hoist out of the per-call path via make_multi_head_forward)
# --------------------------------------------------------------------------- #
def _pack_heads(params, weights_dtype=None):
    """Stack per-head params: w1 side by side, w2 block-diagonal, lane-padded out."""
    keys = list(params.keys())
    n_outs = [int(params[k]["w2"].shape[1]) for k in keys]
    total_out = sum(n_outs)
    out_pad = max(_LANE, _round_up(total_out, _LANE))
    kh = len(keys) * _HIDDEN
    C = int(params[keys[0]]["w1"].shape[0])

    if weights_dtype is None:
        # Auto: keep f32 unless the resident weight pack is a meaningful slice
        # of VMEM; then halve it with bf16 (MXU-native on v5e/v6e/v7x, and the
        # finalize matmul is negligible compute).
        f32_bytes = (C * kh + kh * out_pad) * 4
        weights_dtype = (jnp.bfloat16
                         if f32_bytes > _vmem_capacity_bytes() // 8
                         else jnp.float32)

    w1 = jnp.concatenate([params[k]["w1"] for k in keys], axis=1).astype(weights_dtype)
    b1 = jnp.concatenate([params[k]["b1"] for k in keys], axis=1).astype(weights_dtype)

    # TODO(synk): for large head counts K, keep w2 as K dense [256, n_out] slabs
    # (per-head second matmuls into lane slices) instead of this mostly-zero
    # block-diagonal, to save VMEM and second-layer MXU flops.
    w2 = jnp.zeros((kh, out_pad), weights_dtype)
    b2 = jnp.zeros((1, out_pad), weights_dtype)
    col_off = {}
    off = 0
    for i, k in enumerate(keys):
        n_o = n_outs[i]
        w2 = w2.at[i * _HIDDEN:(i + 1) * _HIDDEN, off:off + n_o].set(
            params[k]["w2"].astype(weights_dtype))
        b2 = b2.at[:, off:off + n_o].set(params[k]["b2"].astype(weights_dtype))
        col_off[k] = (off, n_o)
        off += n_o
    return w1, b1, w2, b2, col_off, out_pad


# --------------------------------------------------------------------------- #
# Tile sizing (budget against the real VMEM limit, per-generation)
# --------------------------------------------------------------------------- #
def _derive_tiles(N, C, S, x_itemsize, resident_w_bytes, vmem_cap, out_pad):
    # Raise the scoped VMEM limit toward capacity (~112 MiB on v5e/v6e, ~56 MiB on v7x).
    vmem_limit = min(vmem_cap * 7 // 8, 116 * _MIB)
    headroom = 4 * _MIB                              # compiler internal scratch

    sublane_x = max(_SUBLANE, 32 // x_itemsize)      # 8 (f32) / 16 (bf16) / 32 (int8)
    c_pad_x = _round_up(C, sublane_x)
    cast_extra = 4 if x_itemsize < 4 else 0          # f32 temp from casting the tile

    # Batch tile: full batch if tiny; otherwise multiples of 8.  If the whole
    # batch fits a single tile, halve it so the "parallel" axis has >= 2 tiles
    # for v7x's two TensorCores (neutral on single-TC v5e/v6e).
    if N <= _SUBLANE:
        tn = N
    else:
        tn = min(_round_up(N, _SUBLANE), 256)
        if N <= tn:
            tn = _round_up(_cdiv(N, 2), _SUBLANE)

    def ts_for(tn_):
        acc_b = _round_up(tn_, _SUBLANE) * _round_up(C, _LANE) * 4
        out_b = 2 * _round_up(tn_, _SUBLANE) * out_pad * 4          # double-buffered out
        budget = vmem_limit - resident_w_bytes - acc_b - out_b - headroom
        per_lane = (tn_ * c_pad_x * 2 * x_itemsize                  # double-buffered x
                    + tn_ * _round_up(C, _SUBLANE) * cast_extra)    # f32 cast temporary
        return max(0, budget) // max(1, per_lane) // _LANE * _LANE

    ts = ts_for(tn)
    # If the S tile is too small to amortize the ~0.35us grid-step overhead,
    # shrink the batch tile (multiples of 8, down to 8) before clamping ts.
    while ts < 4 * _LANE and tn > _SUBLANE:
        tn = max(_SUBLANE, _round_up(tn // 2, _SUBLANE))
        ts = ts_for(tn)

    ts = min(max(ts, _LANE), 2048)   # target 512-2048; never bump over budget silently
    if S <= ts:
        ts = S                        # full extent -> no remainder masking at all
    return tn, ts, vmem_limit


# --------------------------------------------------------------------------- #
# Forward
# --------------------------------------------------------------------------- #
def _forward_packed(x, w1, b1, w2, b2, *, col_off, out_pad):
    """x: NCDHW float tensor; packed weights. Returns {head_key: [N, n_out]} (f32)."""
    N, C = int(x.shape[0]), int(x.shape[1])
    S = 1
    for d in x.shape[2:]:
        S *= int(d)
    x_flat = x.reshape(N, C, S)

    kh = int(w1.shape[1])
    w_itemsize = jnp.dtype(w1.dtype).itemsize
    x_itemsize = jnp.dtype(x.dtype).itemsize
    vmem_cap = _vmem_capacity_bytes()

    # Resident (single-buffered) weight footprint in VMEM.
    resident_w_bytes = (_padded_2d_bytes(C, kh, w_itemsize)
                        + _padded_2d_bytes(1, kh, w_itemsize)
                        + _padded_2d_bytes(kh, out_pad, w_itemsize)
                        + _padded_2d_bytes(1, out_pad, w_itemsize))

    tn, ts, vmem_limit = _derive_tiles(N, C, S, x_itemsize, resident_w_bytes,
                                       vmem_cap, out_pad)
    n_tiles_n = _cdiv(N, tn)
    n_tiles_s = _cdiv(S, ts)

    kernel = functools.partial(_fused_heads_kernel, s_total=S, tile_s=ts)

    flops = 2 * N * C * S + 2 * N * C * kh + 2 * N * kh * out_pad
    bytes_accessed = N * C * S * x_itemsize + resident_w_bytes + N * out_pad * 4

    def _resident_spec(shape):
        # Grid-invariant operands: single-buffer them (double-buffering a constant
        # block just doubles its VMEM footprint).
        index_map = lambda i, s, _n=len(shape): (0,) * _n
        try:
            return pl.BlockSpec(shape, index_map, pipeline_mode=pl.Buffered(1))
        except TypeError:
            return pl.BlockSpec(shape, index_map)

    out_full = pl.pallas_call(
        kernel,
        out_shape=jax.ShapeDtypeStruct((N, out_pad), jnp.float32),
        grid=(n_tiles_n, n_tiles_s),
        in_specs=[
            pl.BlockSpec((tn, C, ts), lambda i, s: (i, 0, s)),   # x: streamed over S
            _resident_spec((C, kh)),                             # w1
            _resident_spec((1, kh)),                             # b1
            _resident_spec((kh, out_pad)),                       # w2 (block-diagonal)
            _resident_spec((1, out_pad)),                        # b2
        ],
        out_specs=pl.BlockSpec((tn, out_pad), lambda i, s: (i, 0)),
        scratch_shapes=[pltpu.VMEM((tn, C), jnp.float32)],
        compiler_params=pltpu.CompilerParams(
            dimension_semantics=("parallel", "arbitrary"),
            vmem_limit_bytes=int(vmem_limit),
        ),
        cost_estimate=pl.CostEstimate(
            flops=flops, transcendentals=0, bytes_accessed=bytes_accessed),
    )(x_flat, w1, b1, w2, b2)

    return {k: out_full[:, off:off + n_o] for k, (off, n_o) in col_off.items()}


def make_multi_head_forward(params, weights_dtype=None):
    """Pack the per-head weights ONCE and return a jitted forward(x) -> dict."""
    w1, b1, w2, b2, col_off, out_pad = _pack_heads(params, weights_dtype)
    fwd = jax.jit(functools.partial(_forward_packed, col_off=col_off, out_pad=out_pad))
    return lambda x: fwd(x, w1, b1, w2, b2)


def multi_head_output_forward(x, params, weights_dtype=None):
    """One-shot convenience wrapper (re-packs each call; prefer make_multi_head_forward)."""
    w1, b1, w2, b2, col_off, out_pad = _pack_heads(params, weights_dtype)
    return _forward_packed(x, w1, b1, w2, b2, col_off=col_off, out_pad=out_pad)


# --------------------------------------------------------------------------- #
# Init + pure-JAX reference
# --------------------------------------------------------------------------- #
def init_params(key, n_in, output_shape, hidden=_HIDDEN, dtype=jnp.float32):
    """Deterministic PyTorch-Linear-style init (U(-1/sqrt(fan_in), 1/sqrt(fan_in)))."""
    params = {}
    for head_key in sorted(output_shape.keys()):
        n_out = output_shape[head_key]
        key, k1, k2, k3, k4 = jax.random.split(key, 5)
        bound1 = 1.0 / (n_in ** 0.5)
        bound2 = 1.0 / (hidden ** 0.5)
        params[head_key] = {
            # stored as [in, out] (transposed w.r.t. torch's [out, in])
            "w1": jax.random.uniform(k1, (n_in, hidden), dtype, -bound1, bound1),
            "b1": jax.random.uniform(k2, (1, hidden), dtype, -bound1, bound1),
            "w2": jax.random.uniform(k3, (hidden, n_out), dtype, -bound2, bound2),
            "b2": jax.random.uniform(k4, (1, n_out), dtype, -bound2, bound2),
        }
    return params


def _reference_forward(x, params):
    N, C = x.shape[0], x.shape[1]
    pooled = jnp.mean(x.reshape(N, C, -1).astype(jnp.float32), axis=-1)
    out = {}
    for k, p in params.items():
        h = pooled @ p["w1"] + p["b1"]
        h = jnp.where(h > 0, h, _LEAKY_SLOPE * h)
        out[k] = h @ p["w2"] + p["b2"]
    return out


if __name__ == "__main__":
    key = jax.random.PRNGKey(0)
    kx, kp = jax.random.split(key)

    # Small shapes consistent with the module:
    #   spatial_shape = (2, 8, 8) -> S = 128, n_in = channels = 4,
    #   output_shape = {"class": 3, "aux": 5}
    N, C, D, H, W = 2, 4, 2, 8, 8
    output_shape = {"class": 3, "aux": 5}

    x = jax.random.normal(kx, (N, C, D, H, W), jnp.float32)   # NCDHW
    params = init_params(kp, n_in=C, output_shape=output_shape)

    # Packing hoisted out of the per-call path (pack once, jit the forward).
    forward = make_multi_head_forward(params)
    out = forward(x)
    out = jax.tree_util.tree_map(jax.block_until_ready, out)

    ref = _reference_forward(x, params)
    for k in output_shape:
        assert out[k].shape == (N, output_shape[k]), (k, out[k].shape)
        assert jnp.allclose(out[k], ref[k], atol=1e-4, rtol=1e-4), k

    print("KERNEL_OK")
</pallas_src>

<mosaic_0001>
module attributes {stable_mosaic.version = 11 : i64} {
  func.func @_fused_heads_kernel(%arg0: i32, %arg1: i32, %arg2: memref<2x4x128xf32, #tpu.memory_space<vmem>>, %arg3: memref<4x512xf32, #tpu.memory_space<vmem>>, %arg4: memref<1x512xf32, #tpu.memory_space<vmem>>, %arg5: memref<512x128xf32, #tpu.memory_space<vmem>>, %arg6: memref<1x128xf32, #tpu.memory_space<vmem>>, %arg7: memref<2x128xf32, #tpu.memory_space<vmem>>, %arg8: memref<2x4xf32, #tpu.memory_space<vmem>>) attributes {dimension_semantics = [#tpu.dimension_semantics<parallel>, #tpu.dimension_semantics<arbitrary>], iteration_bounds = array<i64: 1, 1>, scalar_prefetch = 0 : i64, scratch_operands = 1 : i64, tpu.core_type = #tpu.core_type<tc>, window_params = [{transform_indices = @transform_0, window_bounds = array<i64: 2, 4, 128>}, {pipeline_mode = #tpu.pipeline_mode<synchronous>, transform_indices = @transform_1, window_bounds = array<i64: 4, 512>}, {pipeline_mode = #tpu.pipeline_mode<synchronous>, transform_indices = @transform_2, window_bounds = array<i64: 1, 512>}, {pipeline_mode = #tpu.pipeline_mode<synchronous>, transform_indices = @transform_3, window_bounds = array<i64: 512, 128>}, {pipeline_mode = #tpu.pipeline_mode<synchronous>, transform_indices = @transform_4, window_bounds = array<i64: 1, 128>}, {transform_indices = @transform_5, window_bounds = array<i64: 2, 128>}]} {
    %c0_i32 = arith.constant 0 : i32
    %0 = arith.cmpi eq, %arg1, %c0_i32 : i32
    %1 = arith.extui %0 : i1 to i32
    %c0_i32_0 = arith.constant 0 : i32
    %2 = arith.cmpi ne, %1, %c0_i32_0 : i32
    scf.if %2 {
      %cst_9 = arith.constant 0.000000e+00 : f32
      %11 = vector.broadcast %cst_9 : f32 to vector<2x4xf32>
      %c0_10 = arith.constant 0 : index
      %c0_11 = arith.constant 0 : index
      %12 = vector.load %arg8[%c0_10, %c0_11] : memref<2x4xf32, #tpu.memory_space<vmem>>, vector<2x4xf32>
      tpu.vector_store %arg8[%c0_10, %c0_11], %11 {strides = array<i32>} : memref<2x4xf32, #tpu.memory_space<vmem>>, vector<2x4xf32>,
    } else {
    }
    %c0 = arith.constant 0 : index
    %c0_1 = arith.constant 0 : index
    %c0_2 = arith.constant 0 : index
    %3 = vector.load %arg2[%c0, %c0_1, %c0_2] : memref<2x4x128xf32, #tpu.memory_space<vmem>>, vector<2x4x128xf32>
    %c0_3 = arith.constant 0 : index
    %c0_4 = arith.constant 0 : index
    %4 = vector.load %arg8[%c0_3, %c0_4] : memref<2x4xf32, #tpu.memory_space<vmem>>, vector<2x4xf32>
    %cst = arith.constant dense<0.000000e+00> : vector<2x4xf32>
    %5 = vector.multi_reduction <add>, %3, %cst [2] : vector<2x4x128xf32> to vector<2x4xf32>
    %6 = arith.addf %4, %5 : vector<2x4xf32>
    %c0_5 = arith.constant 0 : index
    %c0_6 = arith.constant 0 : index
    %7 = vector.load %arg8[%c0_5, %c0_6] : memref<2x4xf32, #tpu.memory_space<vmem>>, vector<2x4xf32>
    tpu.vector_store %arg8[%c0_5, %c0_6], %6 {strides = array<i32>} : memref<2x4xf32, #tpu.memory_space<vmem>>, vector<2x4xf32>,
    %c0_i32_7 = arith.constant 0 : i32
    %8 = arith.cmpi eq, %arg1, %c0_i32_7 : i32
    %9 = arith.extui %8 : i1 to i32
    %c0_i32_8 = arith.constant 0 : i32
    %10 = arith.cmpi ne, %9, %c0_i32_8 : i32
    scf.if %10 {
      %c0_9 = arith.constant 0 : index
      %c0_10 = arith.constant 0 : index
      %11 = vector.load %arg8[%c0_9, %c0_10] : memref<2x4xf32, #tpu.memory_space<vmem>>, vector<2x4xf32>
      %cst_11 = arith.constant 7.812500e-03 : f32
      %12 = vector.broadcast %cst_11 : f32 to vector<2x4xf32>
      %13 = arith.mulf %11, %12 : vector<2x4xf32>
      %c0_12 = arith.constant 0 : index
      %c0_13 = arith.constant 0 : index
      %14 = vector.load %arg3[%c0_12, %c0_13] : memref<4x512xf32, #tpu.memory_space<vmem>>, vector<4x512xf32>
      %cst_14 = arith.constant dense<0.000000e+00> : vector<2x512xf32>
      %15 = tpu.matmul %13, %14, %cst_14 {dimension_numbers = #tpu.dot_dimension_numbers<[1], [0], [0], [1], [0, 0, 1, 1], [], []>} : vector<2x4xf32>, vector<4x512xf32>, vector<2x512xf32> -> vector<2x512xf32>
      %c0_15 = arith.constant 0 : index
      %c0_16 = arith.constant 0 : index
      %16 = vector.load %arg4[%c0_15, %c0_16] : memref<1x512xf32, #tpu.memory_space<vmem>>, vector<1x512xf32>
      %17 = vector.broadcast %16 : vector<1x512xf32> to vector<2x512xf32>
      %18 = arith.addf %15, %17 : vector<2x512xf32>
      %cst_17 = arith.constant 0.000000e+00 : f32
      %19 = vector.broadcast %cst_17 : f32 to vector<2x512xf32>
      %20 = arith.cmpf ogt, %18, %19 : vector<2x512xf32>
      %cst_18 = arith.constant 0.00999999977 : f32
      %21 = vector.broadcast %cst_18 : f32 to vector<2x512xf32>
      %22 = arith.mulf %21, %18 : vector<2x512xf32>
      %23 = arith.select %20, %18, %22 : vector<2x512xi1>, vector<2x512xf32>
      %c0_19 = arith.constant 0 : index
      %c0_20 = arith.constant 0 : index
      %24 = vector.load %arg5[%c0_19, %c0_20] : memref<512x128xf32, #tpu.memory_space<vmem>>, vector<512x128xf32>
      %cst_21 = arith.constant dense<0.000000e+00> : vector<2x128xf32>
      %25 = tpu.matmul %23, %24, %cst_21 {dimension_numbers = #tpu.dot_dimension_numbers<[1], [0], [0], [1], [0, 0, 1, 1], [], []>} : vector<2x512xf32>, vector<512x128xf32>, vector<2x128xf32> -> vector<2x128xf32>
      %c0_22 = arith.constant 0 : index
      %c0_23 = arith.constant 0 : index
      %26 = vector.load %arg6[%c0_22, %c0_23] : memref<1x128xf32, #tpu.memory_space<vmem>>, vector<1x128xf32>
      %27 = vector.broadcast %26 : vector<1x128xf32> to vector<2x128xf32>
      %28 = arith.addf %25, %27 : vector<2x128xf32>
      %c0_24 = arith.constant 0 : index
      %c0_25 = arith.constant 0 : index
      %29 = vector.load %arg7[%c0_24, %c0_25] : memref<2x128xf32, #tpu.memory_space<vmem>>, vector<2x128xf32>
      tpu.vector_store %arg7[%c0_24, %c0_25], %28 {strides = array<i32>} : memref<2x128xf32, #tpu.memory_space<vmem>>, vector<2x128xf32>,
    } else {
    }
    return
  }
  func.func @transform_0(%arg0: i32, %arg1: i32) -> (i32, i32, i32) {
    %c0_i32 = arith.constant 0 : i32
    %c0_i32_0 = arith.constant 0 : i32
    return %arg0, %c0_i32, %arg1 : i32, i32, i32
  }
  func.func @transform_1(%arg0: i32, %arg1: i32) -> (i32, i32) {
    %c0_i32 = arith.constant 0 : i32
    %c0_i32_0 = arith.constant 0 : i32
    %c0_i32_1 = arith.constant 0 : i32
    return %c0_i32, %c0_i32_0 : i32, i32
  }
  func.func @transform_2(%arg0: i32, %arg1: i32) -> (i32, i32) {
    %c0_i32 = arith.constant 0 : i32
    %c0_i32_0 = arith.constant 0 : i32
    %c0_i32_1 = arith.constant 0 : i32
    return %c0_i32, %c0_i32_0 : i32, i32
  }
  func.func @transform_3(%arg0: i32, %arg1: i32) -> (i32, i32) {
    %c0_i32 = arith.constant 0 : i32
    %c0_i32_0 = arith.constant 0 : i32
    %c0_i32_1 = arith.constant 0 : i32
    return %c0_i32, %c0_i32_0 : i32, i32
  }
  func.func @transform_4(%arg0: i32, %arg1: i32) -> (i32, i32) {
    %c0_i32 = arith.constant 0 : i32
    %c0_i32_0 = arith.constant 0 : i32
    %c0_i32_1 = arith.constant 0 : i32
    return %c0_i32, %c0_i32_0 : i32, i32
  }
  func.func @transform_5(%arg0: i32, %arg1: i32) -> (i32, i32) {
    %c0_i32 = arith.constant 0 : i32
    %c0_i32_0 = arith.constant 0 : i32
    return %arg0, %c0_i32 : i32, i32
  }
}

</mosaic_0001>

<bundles_post_ra>
// kernel: _forward_packed.1
= control target key start
LH: loop header
LB: loop body
LE: loop exit
PB: predicated region body
PF: predicated region fallthrough
CT: control target
= control target key end

     0   :  { %10 = vsyncpa [#allocation4], 0  ;;  %s655_s18 = smov [#allocation3]   ;;  %s737_s0 = inlined_call_operand.vmem [shape: f32[2,4,128], index: 0, kind: input, shape index: {}]   ;;  %s738_s1 = inlined_call_operand.vmem [shape: f32[4,512], index: 1, kind: input, shape index: {}]   ;;  %s739_s2 = inlined_call_operand.vmem [shape: f32[1,512], index: 2, kind: input, shape index: {}]   ;;  %s740_s3 = inlined_call_operand.hbm [shape: f32[512,128], index: 3, kind: input, shape index: {}]   ;;  %s741_s4 = inlined_call_operand.vmem [shape: f32[1,128], index: 4, kind: input, shape index: {}]   ;;  %s742_s5 = inlined_call_operand.vmem [shape: f32[2,128], index: 5, kind: output, shape index: {}]  }
   0x1   :  { %s22_s19 = sshll.u32 %s655_s18, 4  ;;  %s631_s22 = scalar_lea.hbm %s740_s3, 8192  ;;  %s23_s19 = int_to_ptr.vmem [resolvable:$true] %s22_s19 }
   0x2   :  { %p632_p0 = scmp.ne.s32.totalorder %s740_s3, %s631_s22  ;;  %p635_p1 = scmp.lt.u32.totalorder %s631_s22, %s740_s3 }
   0x4   :  { %p637_p2 = pnand %p635_p1, %p632_p0 }
   0x6   :  { %640 = shalt.err (!%p637_p2)
}
   0x7   :  { %s641_s27 = scalar_lea.vmem %s23_s19, 8192  ;;  %p646_p4 = scmp.lt.s32.totalorder %s23_s19, %s23_s19 }
   0x8   :  { %p642_p3 = scmp.ne.s32.totalorder %s23_s19, %s641_s27  ;;  %p647_p5 = scmp.lt.s32.totalorder %s641_s27, %s641_s27 }
   0xa   :  { %p648_p6 = por %p647_p5, %p646_p4 }
   0xc   :  { %p649_p7 = pnand %p648_p6, %p642_p3 }
   0xe   :  { %652 = shalt.err (!%p649_p7)
}
   0xf   :  { %s656_s28 = smov 128   ;;  %s657_s29 = smov 8  }
  0x10   :  { %28 = dma.hbm_to_vmem [thread:$0]  %s740_s3, 8192, %s23_s19, [#allocation4], %s656_s28, %s656_s28, %s657_s29  }
  0x11   :  { %653 = dma.done.wait [#allocation4], 8192  }
  0x12   :  { %654 = vsyncadd [#allocation4], 4294959104  ;;  %vm43_vm0 = vcmask 1043456   ;;  %v40_v0 = vld [vmem:[%s737_s0] sm:$0xf]  ;;  %vm38_vm1 = vcmask 25600   ;;  %v52_v15 = vlaneseq }
  0x13   :  { %v41_v1 = vld [vmem:[%s737_s0 + $0x4] sm:$0xf]  ;;  %v44_v2 = vsel %vm43_vm0, %v40_v0, 0.0  ;;  %v658_v4 = vmov 0.0   ;;  %v74_v6 = vld [vmem:[%s738_s1 + $0x8] sm:$0xff]  ;;  %vm62_vm2 = vcmask 1041409  }
  0x14   :  { %45 = vadd.xlane.f32.xlu0 %v44_v2  ;;  %v47_v3 = vsel %vm43_vm0, %v41_v1, 0.0  ;;  %39 = vst.msk [vmem:[#allocation2] sm:$0x3] %vm38_vm1, %v658_v4  ;;  %177 = vmatprep.mubr.f32.mxu0 %v658_v4  ;;  %v73_v5 = vld [vmem:[%s738_s1] sm:$0xff]  ;;  %v100_v8 = vcombine.high %v74_v6, %v74_v6  ;;  %v284_v10 = vld [vmem:[#allocation3 + $0x88] sm:$0xff]  ;;  %v53_v16 = vand.u32 127, %v52_v15 }
  0x15   :  { %248 = vmatprep.mubr.f32.mxu1 %v658_v4  ;;  %v99_v7 = vcombine.high %v73_v5, %v73_v5  ;;  %v283_v9 = vld [vmem:[#allocation3 + $0x80] sm:$0xff]  ;;  %v316_v13 = vld [vmem:[#allocation3 + $0x188] sm:$0xff]  ;;  %v720_v17 = vshrl.u32 %v52_v15, 7  ;;  %v285_v30 = vld [vmem:[#allocation3 + $0x90] sm:$0xff]  ;;  %vm101_vm3 = vcmask 31744  }
  0x16   :  { %487 = vmatprep.subr.msk.mxu1 %vm43_vm0, %v100_v8  ;;  %v315_v11 = vld [vmem:[#allocation3 + $0x180] sm:$0xff]  ;;  %v561_v12 = vpack.c.bf16 %v284_v10, %v283_v9  ;;  %v268_v27 = vld [vmem:[#allocation3 + $0x8] sm:$0xff]  ;;  %v286_v31 = vld [vmem:[#allocation3 + $0x98] sm:$0xff] }
  0x17   :  { %484 = vmatprep.subr.msk.mxu0 %vm43_vm0, %v99_v7  ;;  %488 = vmatpush1.msk.msra.mxu1 %vm43_vm0, %v74_v6  ;;  %v593_v14 = vpack.c.bf16 %v316_v13, %v315_v11  ;;  %v56_v19 = vsub.s32 %v53_v16, %v720_v17  ;;  %v267_v26 = vld [vmem:[#allocation3] sm:$0xff]  ;;  %v300_v29 = vld [vmem:[#allocation3 + $0x108] sm:$0xff]  ;;  %v317_v32 = vld [vmem:[#allocation3 + $0x190] sm:$0xff]  ;;  %v565_v40 = vpack.c.bf16 %v286_v31, %v285_v30 }
  0x18   :  { %48 = vadd.xlane.f32.xlu0 %v47_v3  ;;  %485 = vmatpush1.msk.msra.mxu0 %vm43_vm0, %v73_v5  ;;  %v299_v28 = vld [vmem:[#allocation3 + $0x100] sm:$0xff]  ;;  %v318_v33 = vld [vmem:[#allocation3 + $0x198] sm:$0xff]  ;;  %v563_v35 = vpack.c.bf16 %v268_v27, %v267_v26  ;;  %v269_v37 = vld [vmem:[#allocation3 + $0x10] sm:$0xff] }
  0x19   :  { %562 = vmatprep.subr.bf16.mxu0 %v561_v12  ;;  %594 = vmatprep.subr.bf16.mxu1 %v593_v14  ;;  %v595_v36 = vpack.c.bf16 %v300_v29, %v299_v28  ;;  %v270_v38 = vld [vmem:[#allocation3 + $0x18] sm:$0xff]  ;;  %v597_v41 = vpack.c.bf16 %v318_v33, %v317_v32  ;;  %v301_v42 = vld [vmem:[#allocation3 + $0x110] sm:$0xff]  ;;  %v287_v44 = vld [vmem:[#allocation3 + $0xa0] sm:$0xff] }
  0x1a   :  { %v302_v43 = vld [vmem:[#allocation3 + $0x118] sm:$0xff]  ;;  %v288_v45 = vld [vmem:[#allocation3 + $0xa8] sm:$0xff]  ;;  %v319_v46 = vld [vmem:[#allocation3 + $0x1a0] sm:$0xff]  ;;  %v567_v48 = vpack.c.bf16 %v270_v38, %v269_v37 }
  0x1b   :  { %v42_v23 = vld [vmem:[#allocation2] sm:$0x3]  ;;  %v320_v47 = vld [vmem:[#allocation3 + $0x1a8] sm:$0xff]  ;;  %v599_v49 = vpack.c.bf16 %v302_v43, %v301_v42  ;;  %v271_v50 = vld [vmem:[#allocation3 + $0x20] sm:$0xff]  ;;  %v569_v52 = vpack.c.bf16 %v288_v45, %v287_v44 }
  0x1c   :  { %v272_v51 = vld [vmem:[#allocation3 + $0x28] sm:$0xff]  ;;  %v601_v53 = vpack.c.bf16 %v320_v47, %v319_v46  ;;  %v303_v54 = vld [vmem:[#allocation3 + $0x120] sm:$0xff]  ;;  %v289_v56 = vld [vmem:[#allocation3 + $0xb0] sm:$0xff] }
  0x1d   :  { %v304_v55 = vld [vmem:[#allocation3 + $0x128] sm:$0xff]  ;;  %v290_v57 = vld [vmem:[#allocation3 + $0xb8] sm:$0xff]  ;;  %v321_v58 = vld [vmem:[#allocation3 + $0x1b0] sm:$0xff]  ;;  %v571_v60 = vpack.c.bf16 %v272_v51, %v271_v50 }
  0x1e   :  { %v322_v59 = vld [vmem:[#allocation3 + $0x1b8] sm:$0xff]  ;;  %v603_v61 = vpack.c.bf16 %v304_v55, %v303_v54  ;;  %v273_v62 = vld [vmem:[#allocation3 + $0x30] sm:$0xff]  ;;  %v573_v0 = vpack.c.bf16 %v290_v57, %v289_v56  ;;  %v291_v4 = vld [vmem:[#allocation3 + $0xc0] sm:$0xff]  ;;  %v79_v55 = vsub.s32 0, %v720_v17  ;;  %v87_v56 = vsub.s32 2, %v720_v17 }
  0x1f   :  { %v274_v63 = vld [vmem:[#allocation3 + $0x38] sm:$0xff]  ;;  %v605_v1 = vpack.c.bf16 %v322_v59, %v321_v58  ;;  %v305_v2 = vld [vmem:[#allocation3 + $0x130] sm:$0xff]  ;;  %v292_v5 = vld [vmem:[#allocation3 + $0xc8] sm:$0xff]  ;;  %v83_v58 = vsub.s32 1, %v720_v17  ;;  %v91_v59 = vsub.s32 3, %v720_v17 }
  0x20   :  { %v306_v3 = vld [vmem:[#allocation3 + $0x138] sm:$0xff]  ;;  %v323_v6 = vld [vmem:[#allocation3 + $0x1c0] sm:$0xff]  ;;  %v324_v7 = vld [vmem:[#allocation3 + $0x1c8] sm:$0xff]  ;;  %v575_v8 = vpack.c.bf16 %v274_v63, %v273_v62  ;;  %v577_v12 = vpack.c.bf16 %v292_v5, %v291_v4 }
  0x21   :  { %v607_v9 = vpack.c.bf16 %v306_v3, %v305_v2  ;;  %v275_v10 = vld [vmem:[#allocation3 + $0x40] sm:$0xff]  ;;  %v276_v11 = vld [vmem:[#allocation3 + $0x48] sm:$0xff]  ;;  %v609_v13 = vpack.c.bf16 %v324_v7, %v323_v6  ;;  %v293_v16 = vld [vmem:[#allocation3 + $0xd0] sm:$0xff] }
  0x22   :  { %v307_v14 = vld [vmem:[#allocation3 + $0x140] sm:$0xff]  ;;  %v308_v15 = vld [vmem:[#allocation3 + $0x148] sm:$0xff]  ;;  %v278_v26 = vld [vmem:[#allocation3 + $0x58] sm:$0xff] }
  0x23   :  { %v309_v27 = vld [vmem:[#allocation3 + $0x150] sm:$0xff]  ;;  %v310_v28 = vld [vmem:[#allocation3 + $0x158] sm:$0xff]  ;;  %v295_v31 = vld [vmem:[#allocation3 + $0xe0] sm:$0xff] }
  0x24   :  { %v615_v30 = vpack.c.bf16 %v310_v28, %v309_v27  ;;  %v296_v32 = vld [vmem:[#allocation3 + $0xe8] sm:$0xff]  ;;  %v327_v33 = vld [vmem:[#allocation3 + $0x1e0] sm:$0xff]  ;;  %v297_v43 = vld [vmem:[#allocation3 + $0xf0] sm:$0xff] }
  0x25   :  { %v280_v37 = vld [vmem:[#allocation3 + $0x68] sm:$0xff]  ;;  %v298_v44 = vld [vmem:[#allocation3 + $0xf8] sm:$0xff]  ;;  %v329_v45 = vld [vmem:[#allocation3 + $0x1f0] sm:$0xff] }
  0x26   :  { %v589_v46 = vpack.c.bf16 %v298_v44, %v297_v43  ;;  %v330_v47 = vld [vmem:[#allocation3 + $0x1f8] sm:$0xff] }
  0x27   :  { %v621_v50 = vpack.c.bf16 %v330_v47, %v329_v45  ;;  %v75_v57 = vld [vmem:[%s739_s2] sm:$0xf] }
  0x28   :  { %v84_v62 = vrot.slane %v75_v57, %v83_v58  ;;  %v92_v63 = vrot.slane %v75_v57, %v91_v59 }
  0xa1   :  { %v46_v18 = vpop.xlane.xlu0 %45 }
  0xa2   :  { %v57_v21 = vrot.slane %v46_v18, %v56_v19  ;;  %v294_v18 = vld [vmem:[#allocation3 + $0xd8] sm:$0xff] }
  0xa5   :  { %v49_v20 = vpop.xlane.xlu0 %48 }
  0xa6   :  { %v61_v22 = vrot.slane %v49_v20, %v56_v19  ;;  %v325_v19 = vld [vmem:[#allocation3 + $0x1d0] sm:$0xff]  ;;  %v326_v20 = vld [vmem:[#allocation3 + $0x1d8] sm:$0xff] }
  0xa8   :  { %v63_v24 = vsel %vm62_vm2, %v61_v22, %v57_v21  ;;  %v579_v21 = vpack.c.bf16 %v276_v11, %v275_v10  ;;  %v611_v22 = vpack.c.bf16 %v308_v15, %v307_v14 }
  0xa9   :  { %v65_v25 = vadd.f32 %v63_v24, %v42_v23  ;;  %v277_v23 = vld [vmem:[#allocation3 + $0x50] sm:$0xff]  ;;  %v581_v24 = vpack.c.bf16 %v294_v18, %v293_v16  ;;  %v490_v18 = vld [vmem:[%s741_s4] ss:$0 sm:$0xff] }
  0xaa   :  { %v583_v29 = vpack.c.bf16 %v278_v26, %v277_v23 }
  0xab   :  { %67 = vst.msk [vmem:[#allocation2] sm:$0x3] %vm38_vm1, %v65_v25  ;;  %v613_v25 = vpack.c.bf16 %v326_v20, %v325_v19 }
  0xb2   :  { %v71_v34 = vld [vmem:[#allocation2] sm:$0x3] }
  0xb3   :  { %v72_v39 = vmul.f32 0.0078125, %v71_v34  ;;  %v585_v34 = vpack.c.bf16 %v296_v32, %v295_v31 }
  0xb5   :  { %486 = vmatmul.mubr.msk.f32.vlgmr.msra.gmra.mrb[0].mxu0 %vm101_vm3, %v72_v39  ;;  %489 = vmatmul.mubr.msk.f32.vlgmr.msra.gmra.mrb[0].mxu1 %vm101_vm3, %v72_v39 }
  0xb6   :  { %564 = vmatpush3.bf16.msra.mxu0 %v563_v35  ;;  %596 = vmatpush3.bf16.msra.mxu1 %v595_v36  ;;  %v328_v35 = vld [vmem:[#allocation3 + $0x1e8] sm:$0xff]  ;;  %v279_v36 = vld [vmem:[#allocation3 + $0x60] sm:$0xff] }
  0xb7   :  { %566 = vmatprep.subr.bf16.mxu0 %v565_v40  ;;  %598 = vmatprep.subr.bf16.mxu1 %v597_v41  ;;  %v617_v38 = vpack.c.bf16 %v328_v35, %v327_v33  ;;  %v587_v39 = vpack.c.bf16 %v280_v37, %v279_v36  ;;  %v311_v40 = vld [vmem:[#allocation3 + $0x160] sm:$0xff]  ;;  %v312_v41 = vld [vmem:[#allocation3 + $0x168] sm:$0xff] }
  0xb8   :  { %v619_v42 = vpack.c.bf16 %v312_v41, %v311_v40 }
  0xba   :  { %568 = vmatpush3.bf16.msra.mxu0 %v567_v48  ;;  %600 = vmatpush3.bf16.msra.mxu1 %v599_v49  ;;  %v281_v48 = vld [vmem:[#allocation3 + $0x70] sm:$0xff]  ;;  %v282_v49 = vld [vmem:[#allocation3 + $0x78] sm:$0xff] }
  0xbb   :  { %570 = vmatprep.subr.bf16.mxu0 %v569_v52  ;;  %602 = vmatprep.subr.bf16.mxu1 %v601_v53  ;;  %v591_v51 = vpack.c.bf16 %v282_v49, %v281_v48  ;;  %v313_v52 = vld [vmem:[#allocation3 + $0x170] sm:$0xff]  ;;  %v314_v53 = vld [vmem:[#allocation3 + $0x178] sm:$0xff] }
  0xbc   :  { %v623_v54 = vpack.c.bf16 %v314_v53, %v313_v52 }
  0xbe   :  { %572 = vmatpush3.bf16.msra.mxu0 %v571_v60  ;;  %604 = vmatpush3.bf16.msra.mxu1 %v603_v61  ;;  %v80_v60 = vrot.slane %v75_v57, %v79_v55  ;;  %v88_v61 = vrot.slane %v75_v57, %v87_v56 }
  0xbf   :  { %574 = vmatprep.subr.bf16.mxu0 %v573_v0  ;;  %606 = vmatprep.subr.bf16.mxu1 %v605_v1 }
  0xc2   :  { %576 = vmatpush3.bf16.msra.mxu0 %v575_v8  ;;  %608 = vmatpush3.bf16.msra.mxu1 %v607_v9 }
  0xc3   :  { %578 = vmatprep.subr.bf16.mxu0 %v577_v12  ;;  %610 = vmatprep.subr.bf16.mxu1 %v609_v13 }
  0xc6   :  { %580 = vmatpush3.bf16.msra.mxu0 %v579_v21  ;;  %612 = vmatpush3.bf16.msra.mxu1 %v611_v22 }
  0xc7   :  { %582 = vmatprep.subr.bf16.mxu0 %v581_v24  ;;  %614 = vmatprep.subr.bf16.mxu1 %v613_v25 }
  0xca   :  { %584 = vmatpush3.bf16.msra.mxu0 %v583_v29  ;;  %616 = vmatpush3.bf16.msra.mxu1 %v615_v30 }
  0xcb   :  { %586 = vmatprep.subr.bf16.mxu0 %v585_v34  ;;  %618 = vmatprep.subr.bf16.mxu1 %v617_v38 }
  0xce   :  { %588 = vmatpush3.bf16.msra.mxu0 %v587_v39  ;;  %620 = vmatpush3.bf16.msra.mxu1 %v619_v42 }
  0xcf   :  { %590 = vmatprep.subr.bf16.mxu0 %v589_v46  ;;  %622 = vmatprep.subr.bf16.mxu1 %v621_v50 }
  0xd2   :  { %592 = vmatpush3.bf16.msra.mxu0 %v591_v51  ;;  %624 = vmatpush3.bf16.msra.mxu1 %v623_v54 }
 0x188   :  { %v179_v0 = vpop.f32.mrb[0].mxu0  ;;  %v250_v1 = vpop.f32.mrb[0].mxu1 }
 0x189   :  { %v180_v2 = vadd.f32 %v179_v0, %v80_v60  ;;  %v251_v3 = vadd.f32 %v250_v1, %v88_v61  ;;  %v181_v4 = vpop.f32.mrb[1].mxu0  ;;  %v252_v5 = vpop.f32.mrb[1].mxu1 }
 0x18a   :  { %v182_v6 = vadd.f32 %v181_v4, %v84_v62  ;;  %v253_v7 = vadd.f32 %v252_v5, %v92_v63 }
 0x18b   :  { %vm255_vm4 = vcmp.gt.f32.partialorder %v180_v2, 0.0  ;;  %v259_v8 = vmul.f32 0.01, %v180_v2  ;;  %vm257_vm5 = vcmp.gt.f32.partialorder %v251_v3, 0.0  ;;  %v261_v9 = vmul.f32 0.01, %v251_v3 }
 0x18c   :  { %v260_v10 = vmul.f32 0.01, %v182_v6  ;;  %v262_v11 = vmul.f32 0.01, %v253_v7  ;;  %vm256_vm6 = vcmp.gt.f32.partialorder %v182_v6, 0.0  ;;  %vm258_vm7 = vcmp.gt.f32.partialorder %v253_v7, 0.0 }
 0x18d   :  { %v263_v13 = vsel %vm255_vm4, %v180_v2, %v259_v8  ;;  %v265_v14 = vsel %vm257_vm5, %v251_v3, %v261_v9 }
 0x18e   :  { %v264_v17 = vsel %vm256_vm6, %v182_v6, %v260_v10  ;;  %v266_v12 = vsel %vm258_vm7, %v253_v7, %v262_v11 }
 0x18f   :  { %402 = vmatprep.mubr.f32.mxu0 %v264_v17  ;;  %472 = vmatprep.mubr.f32.mxu1 %v266_v12 }
 0x190   :  { %403 = vmatmul.mubr.f32.vlgmr.msra.gmra.mrb[2].mxu0 %v263_v13  ;;  %473 = vmatmul.mubr.f32.vlgmr.msra.gmra.mrb[2].mxu1 %v265_v14 }
 0x263   :  { %v523_v15 = vpop.f32.mrb[2].mxu0  ;;  %v558_v16 = vpop.f32.mrb[2].mxu1 }
 0x264   :  { %v524_v19 = vpop.f32.mrb[3].mxu0  ;;  %v559_v20 = vpop.f32.mrb[3].mxu1 }
 0x265   :  { %v525_v21 = vadd.f32 %v524_v19, %v523_v15  ;;  %v560_v22 = vadd.f32 %v559_v20, %v558_v16 }
 0x267   :  { %v405_v23 = vadd.f32 %v525_v21, %v490_v18 }
 0x269   :  { %v475_v24 = vadd.f32 %v560_v22, %v405_v23 }
 0x26b   :  { %478 = vst [vmem:[%s742_s5] sm:$0x3] %v475_v24 }
 0x26c   :  { %483 = vsyncpa [#allocation4], 1 }

</bundles_post_ra>
